<compile_context>
chip_gen: v5e
topology: v5e:2x2
jax: 0.10.0
libtpu: 0.0.40
codegen_flags: <defaults>
</compile_context>

<pallas_src>
import functools

import jax
import jax.numpy as jnp
from jax import lax
from jax.experimental import pallas as pl
from jax.experimental.pallas import tpu as pltpu

_LANES = 128
_ACC_SUBLANES = 8


def _round_up(x, m):
    return ((x + m - 1) // m) * m


def _cdiv(a, b):
    return -(-a // b)


def _sublane_multiple(dtype):
    # (8, 128) tiles for 4-byte dtypes, (16, 128) for 2-byte, (32, 128) for 1-byte.
    return max(8, 32 // jnp.dtype(dtype).itemsize)


def _combined_loss_kernel(x_ref, t_ref, out_ref, acc_ref, *,
                          alpha, gamma, bce_weight, focal_weight,
                          label_smoothing, binary_targets,
                          lanes, tile_rows, steps_per_core,
                          full_rows, rem_lanes, mask_needed, first_mask_step):
    c = pl.program_id(0)           # "parallel" core-split axis (v7x: one slice per TC)
    i = pl.program_id(1)           # "arbitrary" reduction axis
    g = c * steps_per_core + i     # UNclamped global tile index (used for masking)

    @pl.when(i == 0)
    def _():
        acc_ref[...] = jnp.zeros_like(acc_ref)

    x = x_ref[...].astype(jnp.float32)
    t = t_ref[...].astype(jnp.float32)

    # Numerically-stable BCE-with-logits on raw targets:
    #   bce_raw = max(x,0) - x*t + log1p(exp(-|x|))
    e = jnp.exp(-jnp.abs(x))
    softplus = jnp.log1p(e)
    bce_raw = jnp.maximum(x, 0.0) - x * t + softplus

    # 1 - pt, with pt = exp(-bce_raw) = probability assigned to the target.
    if binary_targets:
        # Fast path for {0,1} targets: pt is sigmoid(x) / 1-sigmoid(x); replaces
        # the second exp with an approx EUP reciprocal (3 -> 2 heavy EUP ops/elem).
        inv = pl.reciprocal(1.0 + e, approx=True)       # sigmoid(|x|)
        sig = jnp.where(x >= 0.0, inv, 1.0 - inv)       # sigmoid(x)
        one_minus_pt = jnp.where(t >= 0.5, 1.0 - sig, sig)
    else:
        one_minus_pt = 1.0 - jnp.exp(-bce_raw)

    gf = float(gamma)
    if gf == int(gf):
        # gamma=2 -> a single multiply on the VPU.
        pow_term = lax.integer_pow(one_minus_pt, int(gf))
    elif 2.0 * gf == int(2.0 * gf):
        # Half-integer gamma: base**k * sqrt(base) (1 EUP op instead of exp+log).
        base = jnp.maximum(one_minus_pt, 0.0)
        pow_term = lax.integer_pow(base, int(gf)) * jnp.sqrt(base)
    else:
        pow_term = jnp.maximum(one_minus_pt, 0.0) ** gf

    # weighted = bce_weight * bce_smoothed + focal_weight * alpha * (1-pt)^g * bce_raw
    # with bce_smoothed = bce_raw + label_smoothing * x * (t - 0.5) folded in and
    # all scalar products pre-folded at trace time.
    weighted = bce_raw * (bce_weight + (focal_weight * alpha) * pow_term)
    if label_smoothing > 0.0:
        weighted = weighted + (bce_weight * label_smoothing) * (x * (t - 0.5))

    def _accum(w):
        # Pure-VPU per-tile reduction into a one-vreg (8, 128) accumulator; the
        # cross-sublane reduce is deferred to the wrapper's jnp.sum.
        acc_ref[...] += w.reshape(tile_rows // _ACC_SUBLANES,
                                  _ACC_SUBLANES, lanes).sum(axis=0)

    if mask_needed:
        # Only boundary / duplicate tiles pay for the mask (cold branch).
        @pl.when(g < first_mask_step)
        def _():
            _accum(weighted)

        @pl.when(g >= first_mask_step)
        def _():
            r = lax.broadcasted_iota(jnp.int32, (tile_rows, lanes), 0)
            l = lax.broadcasted_iota(jnp.int32, (tile_rows, lanes), 1)
            grow = g * tile_rows + r
            valid = (grow < full_rows) | ((grow == full_rows) & (l < rem_lanes))
            _accum(jnp.where(valid, weighted, 0.0))
    else:
        _accum(weighted)

    @pl.when(i == pl.num_programs(1) - 1)
    def _():
        out_ref[0] = acc_ref[...]


def combined_loss(inputs, targets, *, alpha=1.0, gamma=2.0, bce_weight=0.5,
                  focal_weight=0.5, label_smoothing=0.0, binary_targets=False,
                  tile_rows=4096, lanes=_LANES):
    """CombinedLoss forward.  inputs/targets: same (arbitrary) shape, e.g. NCHW."""
    assert inputs.shape == targets.shape
    total = int(inputs.size)
    assert total > 0

    sub = max(_sublane_multiple(inputs.dtype), _sublane_multiple(targets.dtype))

    x_flat = inputs.reshape(-1)
    t_flat = targets.reshape(-1)
    rem_lanes = total % lanes
    if rem_lanes:
        # Only a sub-128-element pad so the lane-dense reshape below is legal.
        # (No full tile/row padding any more; ragged tails are masked in-kernel.)
        pad = lanes - rem_lanes
        x_flat = jnp.pad(x_flat, (0, pad))
        t_flat = jnp.pad(t_flat, (0, pad))
    rows = _cdiv(total, lanes)
    x2d = x_flat.reshape(rows, lanes)      # free bitcast when total % 128 == 0
    t2d = t_flat.reshape(rows, lanes)

    tile_rows = max(sub, min(_round_up(int(tile_rows), sub), _round_up(rows, sub)))

    total_steps = _cdiv(rows, tile_rows)
    n_par = 2 if total_steps >= 2 else 1   # v7x: one "parallel" slice per TensorCore
    steps_per_core = _cdiv(total_steps, n_par)
    last_block = total_steps - 1

    full_rows = total // lanes
    covered = n_par * steps_per_core * tile_rows * lanes
    mask_needed = covered != total
    first_mask_step = full_rows // tile_rows   # first global tile needing the mask

    if n_par * steps_per_core == total_steps:
        index_map = lambda c, i: (c * steps_per_core + i, 0)
    else:
        # Core-split rounding: out-of-range steps re-read the last valid block;
        # the in-kernel mask (keyed on the UNclamped index) zeroes them.
        index_map = lambda c, i: (jnp.minimum(c * steps_per_core + i, last_block), 0)

    kernel = functools.partial(
        _combined_loss_kernel,
        alpha=float(alpha), gamma=float(gamma),
        bce_weight=float(bce_weight), focal_weight=float(focal_weight),
        label_smoothing=float(label_smoothing), binary_targets=bool(binary_targets),
        lanes=lanes, tile_rows=tile_rows, steps_per_core=steps_per_core,
        full_rows=full_rows, rem_lanes=rem_lanes,
        mask_needed=mask_needed, first_mask_step=first_mask_step)

    partials = pl.pallas_call(
        kernel,
        out_shape=jax.ShapeDtypeStruct((n_par, _ACC_SUBLANES, lanes), jnp.float32),
        grid_spec=pltpu.PrefetchScalarGridSpec(
            num_scalar_prefetch=0,
            grid=(n_par, steps_per_core),
            in_specs=[
                pl.BlockSpec((tile_rows, lanes), index_map),
                pl.BlockSpec((tile_rows, lanes), index_map),
            ],
            out_specs=pl.BlockSpec((1, _ACC_SUBLANES, lanes), lambda c, i: (c, 0, 0)),
            scratch_shapes=[pltpu.VMEM((_ACC_SUBLANES, lanes), jnp.float32)],
        ),
        compiler_params=pltpu.CompilerParams(
            dimension_semantics=("parallel", "arbitrary"),
            vmem_limit_bytes=48 * 1024 * 1024),
    )(x2d, t2d)

    # Tiny final cross-lane / cross-core reduction + mean in plain JAX.
    return jnp.sum(partials) / total


def _reference_combined_loss(inputs, targets, *, alpha=1.0, gamma=2.0,
                             bce_weight=0.5, focal_weight=0.5,
                             label_smoothing=0.0):
    x = inputs.astype(jnp.float32)
    t = targets.astype(jnp.float32)
    sp = jnp.log1p(jnp.exp(-jnp.abs(x)))
    relu_x = jnp.maximum(x, 0.0)
    bce_raw = relu_x - x * t + sp
    if label_smoothing > 0:
        t_s = t * (1.0 - label_smoothing) + 0.5 * label_smoothing
        bce = jnp.mean(relu_x - x * t_s + sp)
    else:
        bce = jnp.mean(bce_raw)
    pt = jnp.exp(-bce_raw)
    focal = jnp.mean(alpha * (1.0 - pt) ** gamma * bce_raw)
    return bce_weight * bce + focal_weight * focal


if __name__ == "__main__":
    key = jax.random.PRNGKey(0)
    k1, k2, k3, k4, k5, k6 = jax.random.split(key, 6)

    # Segmentation-style logits/targets, NCHW; size is a multiple of 128 ->
    # zero-copy path (no pad, no mask).
    B, C, H, W = 2, 4, 16, 16
    logits = jax.random.normal(k1, (B, C, H, W), dtype=jnp.float32) * 2.0
    targets = (jax.random.uniform(k2, (B, C, H, W)) > 0.5).astype(jnp.float32)

    loss = jax.block_until_ready(
        combined_loss(logits, targets, alpha=1.0, gamma=2.0,
                      bce_weight=0.5, focal_weight=0.5, label_smoothing=0.0))
    ref = _reference_combined_loss(logits, targets)
    assert jnp.allclose(loss, ref, rtol=1e-4, atol=1e-5), (loss, ref)

    # Ragged size + label smoothing + half-integer gamma (lane pad + masked tile).
    x2 = jax.random.normal(k3, (2, 3, 7, 5), dtype=jnp.float32)
    t2 = jax.random.uniform(k4, (2, 3, 7, 5), dtype=jnp.float32)
    loss2 = jax.block_until_ready(
        combined_loss(x2, t2, alpha=0.75, gamma=1.5, bce_weight=0.3,
                      focal_weight=0.7, label_smoothing=0.1))
    ref2 = _reference_combined_loss(x2, t2, alpha=0.75, gamma=1.5, bce_weight=0.3,
                                    focal_weight=0.7, label_smoothing=0.1)
    assert jnp.allclose(loss2, ref2, rtol=1e-4, atol=1e-5), (loss2, ref2)

    # bf16 inputs, odd number of tiles -> 2-way core split with one clamped
    # duplicate tile that the mask zeroes out.
    x3 = (jax.random.normal(k5, (3, 8, 32, 32)) * 2.0).astype(jnp.bfloat16)
    t3 = (jax.random.uniform(k6, (3, 8, 32, 32)) > 0.5).astype(jnp.bfloat16)
    loss3 = jax.block_until_ready(combined_loss(x3, t3, tile_rows=64))
    ref3 = _reference_combined_loss(x3, t3)
    assert jnp.allclose(loss3, ref3, rtol=1e-4, atol=1e-5), (loss3, ref3)

    # Opt-in binary-target fast path (one fewer EUP transcendental per element;
    # approx reciprocal -> slightly looser tolerance).
    loss4 = jax.block_until_ready(
        combined_loss(x3, t3, tile_rows=64, binary_targets=True))
    assert jnp.allclose(loss4, ref3, rtol=1e-2, atol=1e-3), (loss4, ref3)

    print("KERNEL_OK")
</pallas_src>

<mosaic_0001>
module attributes {stable_mosaic.version = 11 : i64} {
  func.func @_combined_loss_kernel(%arg0: i32, %arg1: i32, %arg2: memref<16x128xf32, #tpu.memory_space<vmem>>, %arg3: memref<16x128xf32, #tpu.memory_space<vmem>>, %arg4: memref<1x8x128xf32, #tpu.memory_space<vmem>>, %arg5: memref<8x128xf32, #tpu.memory_space<vmem>>) attributes {dimension_semantics = [#tpu.dimension_semantics<parallel>, #tpu.dimension_semantics<arbitrary>], iteration_bounds = array<i64: 1, 1>, scalar_prefetch = 0 : i64, scratch_operands = 1 : i64, tpu.core_type = #tpu.core_type<tc>, window_params = [{transform_indices = @transform_0, window_bounds = array<i64: 16, 128>}, {transform_indices = @transform_1, window_bounds = array<i64: 16, 128>}, {transform_indices = @transform_2, window_bounds = array<i64: 1, 8, 128>}]} {
    %c0_i32 = arith.constant 0 : i32
    %0 = arith.cmpi eq, %arg1, %c0_i32 : i32
    %1 = arith.extui %0 : i1 to i32
    %c0_i32_0 = arith.constant 0 : i32
    %2 = arith.cmpi ne, %1, %c0_i32_0 : i32
    scf.if %2 {
      %cst_16 = arith.constant 0.000000e+00 : f32
      %34 = vector.broadcast %cst_16 : f32 to vector<8x128xf32>
      %c0_17 = arith.constant 0 : index
      %c0_18 = arith.constant 0 : index
      %35 = vector.load %arg5[%c0_17, %c0_18] : memref<8x128xf32, #tpu.memory_space<vmem>>, vector<8x128xf32>
      tpu.vector_store %arg5[%c0_17, %c0_18], %34 {strides = array<i32>} : memref<8x128xf32, #tpu.memory_space<vmem>>, vector<8x128xf32>,
    } else {
    }
    %c0 = arith.constant 0 : index
    %c0_1 = arith.constant 0 : index
    %3 = vector.load %arg2[%c0, %c0_1] : memref<16x128xf32, #tpu.memory_space<vmem>>, vector<16x128xf32>
    %c0_2 = arith.constant 0 : index
    %c0_3 = arith.constant 0 : index
    %4 = vector.load %arg3[%c0_2, %c0_3] : memref<16x128xf32, #tpu.memory_space<vmem>>, vector<16x128xf32>
    %5 = math.absf %3 : vector<16x128xf32>
    %cst = arith.constant 0.000000e+00 : f32
    %6 = vector.broadcast %cst : f32 to vector<16x128xf32>
    %7 = arith.subf %6, %5 : vector<16x128xf32>
    %8 = math.exp %7 : vector<16x128xf32>
    %9 = math.log1p %8 : vector<16x128xf32>
    %cst_4 = arith.constant 0.000000e+00 : f32
    %10 = vector.broadcast %cst_4 : f32 to vector<16x128xf32>
    %11 = arith.maximumf %3, %10 : vector<16x128xf32>
    %12 = arith.mulf %3, %4 : vector<16x128xf32>
    %13 = arith.subf %11, %12 : vector<16x128xf32>
    %14 = arith.addf %13, %9 : vector<16x128xf32>
    %cst_5 = arith.constant 0.000000e+00 : f32
    %15 = vector.broadcast %cst_5 : f32 to vector<16x128xf32>
    %16 = arith.subf %15, %14 : vector<16x128xf32>
    %17 = math.exp %16 : vector<16x128xf32>
    %cst_6 = arith.constant 1.000000e+00 : f32
    %18 = vector.broadcast %cst_6 : f32 to vector<16x128xf32>
    %19 = arith.subf %18, %17 : vector<16x128xf32>
    %20 = arith.mulf %19, %19 : vector<16x128xf32>
    %cst_7 = arith.constant 5.000000e-01 : f32
    %21 = vector.broadcast %cst_7 : f32 to vector<16x128xf32>
    %22 = arith.mulf %21, %20 : vector<16x128xf32>
    %cst_8 = arith.constant 5.000000e-01 : f32
    %23 = vector.broadcast %cst_8 : f32 to vector<16x128xf32>
    %24 = arith.addf %23, %22 : vector<16x128xf32>
    %25 = arith.mulf %14, %24 : vector<16x128xf32>
    %c0_9 = arith.constant 0 : index
    %c0_10 = arith.constant 0 : index
    %26 = vector.load %arg5[%c0_9, %c0_10] : memref<8x128xf32, #tpu.memory_space<vmem>>, vector<8x128xf32>
    %27 = vector.shape_cast %25 : vector<16x128xf32> to vector<2x8x128xf32>
    %cst_11 = arith.constant dense<0.000000e+00> : vector<8x128xf32>
    %28 = vector.multi_reduction <add>, %27, %cst_11 [0] : vector<2x8x128xf32> to vector<8x128xf32>
    %29 = arith.addf %26, %28 : vector<8x128xf32>
    %c0_12 = arith.constant 0 : index
    %c0_13 = arith.constant 0 : index
    %30 = vector.load %arg5[%c0_12, %c0_13] : memref<8x128xf32, #tpu.memory_space<vmem>>, vector<8x128xf32>
    tpu.vector_store %arg5[%c0_12, %c0_13], %29 {strides = array<i32>} : memref<8x128xf32, #tpu.memory_space<vmem>>, vector<8x128xf32>,
    %c0_i32_14 = arith.constant 0 : i32
    %31 = arith.cmpi eq, %arg1, %c0_i32_14 : i32
    %32 = arith.extui %31 : i1 to i32
    %c0_i32_15 = arith.constant 0 : i32
    %33 = arith.cmpi ne, %32, %c0_i32_15 : i32
    scf.if %33 {
      %c0_16 = arith.constant 0 : index
      %c0_17 = arith.constant 0 : index
      %34 = vector.load %arg5[%c0_16, %c0_17] : memref<8x128xf32, #tpu.memory_space<vmem>>, vector<8x128xf32>
      %c0_18 = arith.constant 0 : index
      %c0_19 = arith.constant 0 : index
      %c0_20 = arith.constant 0 : index
      %35 = vector.load %arg4[%c0_18, %c0_19, %c0_20] : memref<1x8x128xf32, #tpu.memory_space<vmem>>, vector<1x8x128xf32>
      %36 = vector.shape_cast %35 : vector<1x8x128xf32> to vector<8x128xf32>
      %37 = vector.shape_cast %34 : vector<8x128xf32> to vector<1x8x128xf32>
      tpu.vector_store %arg4[%c0_18, %c0_19, %c0_20], %37 {strides = array<i32>} : memref<1x8x128xf32, #tpu.memory_space<vmem>>, vector<1x8x128xf32>,
    } else {
    }
    return
  }
  func.func @transform_0(%arg0: i32, %arg1: i32) -> (i32, i32) {
    %c1_i32 = arith.constant 1 : i32
    %0 = arith.muli %arg0, %c1_i32 : i32
    %1 = arith.addi %0, %arg1 : i32
    %c0_i32 = arith.constant 0 : i32
    %c0_i32_0 = arith.constant 0 : i32
    return %1, %c0_i32 : i32, i32
  }
  func.func @transform_1(%arg0: i32, %arg1: i32) -> (i32, i32) {
    %c1_i32 = arith.constant 1 : i32
    %0 = arith.muli %arg0, %c1_i32 : i32
    %1 = arith.addi %0, %arg1 : i32
    %c0_i32 = arith.constant 0 : i32
    %c0_i32_0 = arith.constant 0 : i32
    return %1, %c0_i32 : i32, i32
  }
  func.func @transform_2(%arg0: i32, %arg1: i32) -> (i32, i32, i32) {
    %c0_i32 = arith.constant 0 : i32
    %c0_i32_0 = arith.constant 0 : i32
    %c0_i32_1 = arith.constant 0 : i32
    return %arg0, %c0_i32, %c0_i32_0 : i32, i32, i32
  }
}

</mosaic_0001>

<bundles_post_ra>
// kernel: tpu_custom_call.1
= control target key start
LH: loop header
LB: loop body
LE: loop exit
PB: predicated region body
PF: predicated region fallthrough
CT: control target
= control target key end

     0   :  { %7 = vsyncpa [#allocation4], 0  ;;  %s266_s0 = inlined_call_operand.hbm [shape: f32[16,128], index: 0, kind: input, shape index: {}]   ;;  %s267_s1 = inlined_call_operand.hbm [shape: f32[16,128], index: 1, kind: input, shape index: {}]   ;;  %s268_s2 = inlined_call_operand.hbm [shape: f32[1,8,128], index: 2, kind: output, shape index: {}]  }
   0x1   :  { %8 = vsyncpa [#allocation7], 0 }
   0x2   :  { %9 = vsyncpa [#allocation5], 0  ;;  %s18_s11 = sshll.u32 %s266_s0, 4  ;;  %s237_s12 = smov [#allocation3]   ;;  %s19_s11 = int_to_ptr.hbm [resolvable:$true] %s18_s11 }
   0x3   :  { %s20_s13 = sshll.u32 %s237_s12, 4  ;;  %s35_s16 = sshll.u32 %s267_s1, 4  ;;  %s21_s13 = int_to_ptr.vmem [resolvable:$true] %s20_s13  ;;  %s36_s16 = int_to_ptr.hbm [resolvable:$true] %s35_s16 }
   0x4   :  { %s238_s17 = smov 128   ;;  %s239_s18 = smov 8  }
   0x5   :  { %26 = dma.hbm_to_vmem [thread:$0]  %s19_s11, 256, %s21_s13, [#allocation4], %s238_s17, %s238_s17, %s239_s18  }
   0x6   :  { %s240_s19 = smov [#allocation6]  }
   0x7   :  { %s37_s20 = sshll.u32 %s240_s19, 4  ;;  %s38_s20 = int_to_ptr.vmem [resolvable:$true] %s37_s20 }
   0x8   :  { %43 = dma.hbm_to_vmem [thread:$0]  %s36_s16, 256, %s38_s20, [#allocation7], %s238_s17, %s238_s17, %s239_s18  }
   0x9   :  { %231 = dma.done.wait [#allocation4], 256  }
   0xa   :  { %232 = vsyncadd [#allocation4], 4294967040 }
   0xb   :  { %233 = dma.done.wait [#allocation7], 256  }
   0xc   :  { %234 = vsyncadd [#allocation7], 4294967040  ;;  %v61_v0 = vld [vmem:[#allocation3] sm:$0xff]  ;;  %v62_v1 = vld [vmem:[#allocation3 + $0x8] sm:$0xff]  ;;  %s241_s0 = smov [#allocation8]   ;;  %s131_s23 = sshll.u32 %s268_s2, 4  ;;  %s132_s23 = int_to_ptr.hbm [resolvable:$true] %s131_s23 }
   0xd   :  { %v65_v2 = vand.u32 2147483647, %v61_v0  ;;  %v66_v3 = vand.u32 2147483647, %v62_v1  ;;  %v63_v12 = vld [vmem:[#allocation6] sm:$0xff]  ;;  %v64_v15 = vld [vmem:[#allocation6 + $0x8] sm:$0xff] }
   0xe   :  { %v91_v19 = vmax.f32 %v61_v0, 0.0  ;;  %v93_v20 = vmul.f32 %v63_v12, %v61_v0  ;;  %v92_v22 = vmax.f32 %v62_v1, 0.0  ;;  %v94_v23 = vmul.f32 %v64_v15, %v62_v1  ;;  %s129_s1 = sshll.u32 %s241_s0, 4  ;;  %s130_s1 = int_to_ptr.vmem [resolvable:$true] %s129_s1 }
   0xf   :  { %v67_v4 = vsub.f32 0.0, %v65_v2  ;;  %v68_v5 = vsub.f32 0.0, %v66_v3 }
  0x10   :  { %v95_v27 = vsub.f32 %v91_v19, %v93_v20  ;;  %v96_v30 = vsub.f32 %v92_v22, %v94_v23 }
  0x11   :  { %v69_v6 = vmul.f32 1.442695, %v67_v4  ;;  %v71_v7 = vmul.f32 1.442695, %v68_v5 }
  0x13   :  { %147 = vpow2.f32 %v69_v6 }
  0x14   :  { %149 = vpow2.f32 %v71_v7 }
  0x19   :  { %v148_v8 = vpop.eup %147 }
  0x1a   :  { %v150_v9 = vpop.eup %149  ;;  %v73_v10 = vadd.f32 1.0, %v148_v8  ;;  %v76_v11 = vmul.f32 -0.5, %v148_v8  ;;  %v79_v17 = vand.u32 2147483647, %v148_v8 }
  0x1b   :  { %v82_v13 = vadd.f32 1.0, %v150_v9  ;;  %v85_v14 = vmul.f32 -0.5, %v150_v9  ;;  %v88_v21 = vand.u32 2147483647, %v150_v9 }
  0x1c   :  { %151 = vlog2.f32 %v73_v10  ;;  %v77_v16 = vadd.f32 1.0, %v76_v11  ;;  %vm80_vm0 = vcmp.lt.f32.partialorder %v79_v17, 0.0004427343 }
  0x1d   :  { %153 = vlog2.f32 %v82_v13  ;;  %v86_v18 = vadd.f32 1.0, %v85_v14  ;;  %vm89_vm1 = vcmp.lt.f32.partialorder %v88_v21, 0.0004427343 }
  0x1e   :  { %v78_v24 = vmul.f32 %v148_v8, %v77_v16 }
  0x1f   :  { %v87_v26 = vmul.f32 %v150_v9, %v86_v18 }
  0x22   :  { %v152_v25 = vpop.eup %151 }
  0x23   :  { %v154_v28 = vpop.eup %153  ;;  %v75_v29 = vmul.f32 0.6931472, %v152_v25 }
  0x24   :  { %v84_v31 = vmul.f32 0.6931472, %v154_v28 }
  0x25   :  { %v81_v32 = vsel %vm80_vm0, %v78_v24, %v75_v29 }
  0x26   :  { %v90_v33 = vsel %vm89_vm1, %v87_v26, %v84_v31  ;;  %v97_v34 = vadd.f32 %v95_v27, %v81_v32 }
  0x27   :  { %v98_v35 = vadd.f32 %v96_v30, %v90_v33 }
  0x28   :  { %v99_v36 = vsub.f32 0.0, %v97_v34 }
  0x29   :  { %v100_v37 = vsub.f32 0.0, %v98_v35 }
  0x2a   :  { %v101_v38 = vmul.f32 1.442695, %v99_v36 }
  0x2b   :  { %v103_v39 = vmul.f32 1.442695, %v100_v37 }
  0x2c   :  { %155 = vpow2.f32 %v101_v38 }
  0x2d   :  { %157 = vpow2.f32 %v103_v39 }
  0x32   :  { %v156_v40 = vpop.eup %155 }
  0x33   :  { %v158_v41 = vpop.eup %157  ;;  %v105_v42 = vsub.f32 1.0, %v156_v40 }
  0x34   :  { %v106_v43 = vsub.f32 1.0, %v158_v41 }
  0x35   :  { %v107_v44 = vmul.f32 %v105_v42, %v105_v42 }
  0x36   :  { %v108_v45 = vmul.f32 %v106_v43, %v106_v43 }
  0x37   :  { %v109_v46 = vmul.f32 0.5, %v107_v44 }
  0x38   :  { %v110_v47 = vmul.f32 0.5, %v108_v45 }
  0x39   :  { %v111_v48 = vadd.f32 0.5, %v109_v46 }
  0x3a   :  { %v112_v49 = vadd.f32 0.5, %v110_v47 }
  0x3b   :  { %v113_v50 = vmul.f32 %v111_v48, %v97_v34 }
  0x3c   :  { %v114_v51 = vmul.f32 %v112_v49, %v98_v35 }
  0x3e   :  { %v116_v52 = vadd.f32 %v114_v51, %v113_v50 }
  0x40   :  { %123 = vst [vmem:[#allocation8] sm:$0xff] %v116_v52 }
  0x41   :  { %134 = dma.vmem_to_hbm [thread:$0]  %s130_s1, 128, %s132_s23, [#allocation5]  }
  0x42   :  { %235 = dma.done.wait [#allocation5], 128  }
  0x43   :  { %236 = vsyncadd [#allocation5], 4294967168 }
  0x44   :  { %139 = vsyncpa [#allocation4], 1 }
  0x45   :  { %140 = vsyncpa [#allocation7], 1 }
  0x46   :  { %141 = vsyncpa [#allocation5], 1 }

</bundles_post_ra>
